<compile_context>
chip_gen: v5e
topology: v5e:2x2
jax: 0.10.0
libtpu: 0.0.40
codegen_flags: <defaults>
</compile_context>

<pallas_src>
import math

import jax
import jax.numpy as jnp
from jax.experimental import pallas as pl
from jax.experimental.pallas import tpu as pltpu


def _one_param_kernel(alpha_ref, x1_ref, x2_ref, o_ref):
    # alpha_ref: (1, 1) f32 scalar in SMEM; x1/x2/o: (block_rows, lane) VMEM tiles.
    alpha = alpha_ref[0, 0]
    x1 = x1_ref[...]
    x2 = x2_ref[...]
    # Compute in f32 (keeps the learnable scalar un-quantized for bf16/fp16
    # inputs); no-op cast for f32 inputs.
    o_ref[...] = (x1.astype(jnp.float32) + x2.astype(jnp.float32) * alpha).astype(
        o_ref.dtype
    )


def _pick_lane(total):
    """Largest lane width in {1024, 512, 256, 128} that divides `total`."""
    for lane in (1024, 512, 256, 128):
        if total % lane == 0:
            return lane
    return None


def one_param_forward(
    x1,
    x2,
    alpha,
    *,
    min_pallas_bytes=1 << 20,       # below ~1 MiB the kernel is pure overhead
    target_block_bytes=4 << 20,     # ~4 MiB per operand per grid step
):
    """Computes x1 + x2 * alpha with a tiled, lane-dense Pallas TPU kernel.

    x1, x2: same shape (any rank, e.g. NCHW) and same floating dtype.
    alpha:  scalar parameter (shape (1,) like nn.Parameter(torch.Tensor(1))).
    """
    assert x1.shape == x2.shape and x1.dtype == x2.dtype
    assert jnp.issubdtype(x1.dtype, jnp.floating), (
        "OneParam kernel expects floating-point inputs"
    )

    orig_shape = x1.shape
    dtype = x1.dtype
    itemsize = jnp.dtype(dtype).itemsize
    total = math.prod(orig_shape) if orig_shape else 1
    nbytes = total * itemsize

    alpha_f32 = jnp.asarray(alpha, dtype=jnp.float32).reshape(())

    lane = _pick_lane(total) if total > 0 else None
    if lane is None or nbytes < min_pallas_bytes:
        # Fast path / fallback: single fused XLA elementwise pass, no copies.
        return (
            x1.astype(jnp.float32) + x2.astype(jnp.float32) * alpha_f32
        ).astype(dtype)

    rows = total // lane

    # Block rows: ~target_block_bytes per operand, aligned to the packed
    # sublane multiple (8 for 4-byte, 16 for 2-byte, 32 for 1-byte dtypes).
    packing = max(1, 4 // itemsize)
    sub_mult = 8 * packing
    block_rows = max(sub_mult, (target_block_bytes // (lane * itemsize)) // sub_mult * sub_mult)
    if rows <= block_rows:
        block_rows = rows  # single full-extent block (always legal)

    grid = (pl.cdiv(rows, block_rows),)  # ragged trailing block handled by Pallas

    # Contiguous reshape -> no data movement (unlike the old pad/slice path).
    x1_2d = x1.reshape(rows, lane)
    x2_2d = x2.reshape(rows, lane)
    alpha_2d = alpha_f32.reshape(1, 1)

    out_2d = pl.pallas_call(
        _one_param_kernel,
        out_shape=jax.ShapeDtypeStruct((rows, lane), dtype),
        grid=grid,
        in_specs=[
            pl.BlockSpec(memory_space=pltpu.SMEM),                 # alpha scalar
            pl.BlockSpec((block_rows, lane), lambda i: (i, 0)),    # x1 tile
            pl.BlockSpec((block_rows, lane), lambda i: (i, 0)),    # x2 tile
        ],
        out_specs=pl.BlockSpec((block_rows, lane), lambda i: (i, 0)),
        compiler_params=pltpu.CompilerParams(
            dimension_semantics=("parallel",),   # shard row tiles across TCs
            vmem_limit_bytes=40 * 1024 * 1024,   # 24 MiB used + headroom; safe on all gens
        ),
    )(alpha_2d, x1_2d, x2_2d)

    return out_2d.reshape(orig_shape)


if __name__ == "__main__":
    key = jax.random.PRNGKey(0)
    k1, k2, k3, k4 = jax.random.split(key, 4)

    # Deterministic init of the single learnable parameter alpha.
    alpha = jnp.array([0.5], dtype=jnp.float32)

    # Case 1: small NCHW shape consistent with an image-model combination
    # module; force the Pallas path (min_pallas_bytes=0) so the kernel runs.
    x1 = jax.random.normal(k1, (2, 4, 16, 16), dtype=jnp.float32)
    x2 = jax.random.normal(k2, (2, 4, 16, 16), dtype=jnp.float32)
    out = jax.block_until_ready(one_param_forward(x1, x2, alpha, min_pallas_bytes=0))
    ref = x1 + x2 * alpha[0]
    assert out.shape == ref.shape
    assert jnp.allclose(out, ref, atol=1e-6), "mismatch vs reference (case 1)"

    # Case 2: row count (30) not a multiple of block_rows (16) -> exercises the
    # ragged trailing block with no host-side padding or output slicing.
    y1 = jax.random.normal(k3, (4, 4, 30, 64), dtype=jnp.float32)
    y2 = jax.random.normal(k4, (4, 4, 30, 64), dtype=jnp.float32)
    out2 = jax.block_until_ready(
        one_param_forward(
            y1, y2, alpha, min_pallas_bytes=0, target_block_bytes=64 * 1024
        )
    )
    ref2 = y1 + y2 * alpha[0]
    assert jnp.allclose(out2, ref2, atol=1e-6), "mismatch vs reference (case 2)"

    # Case 3: element count not a multiple of 128 -> fused-XLA fallback path.
    z1 = jax.random.normal(k1, (2, 3, 7, 5), dtype=jnp.float32)
    z2 = jax.random.normal(k2, (2, 3, 7, 5), dtype=jnp.float32)
    out3 = jax.block_until_ready(one_param_forward(z1, z2, alpha))
    assert jnp.allclose(out3, z1 + z2 * alpha[0], atol=1e-6), "mismatch (case 3)"

    print("KERNEL_OK")
</pallas_src>

<mosaic_0001>
module attributes {stable_mosaic.version = 11 : i64} {
  func.func @_one_param_kernel(%arg0: i32, %arg1: memref<1x1xf32, #tpu.memory_space<smem>>, %arg2: memref<2x1024xf32, #tpu.memory_space<vmem>>, %arg3: memref<2x1024xf32, #tpu.memory_space<vmem>>, %arg4: memref<2x1024xf32, #tpu.memory_space<vmem>>) attributes {dimension_semantics = [#tpu.dimension_semantics<parallel>], iteration_bounds = array<i64: 1>, scalar_prefetch = 0 : i64, scratch_operands = 0 : i64, tpu.core_type = #tpu.core_type<tc>, window_params = [{transform_indices = @transform_0, window_bounds = array<i64: 1, 1>}, {transform_indices = @transform_1, window_bounds = array<i64: 2, 1024>}, {transform_indices = @transform_2, window_bounds = array<i64: 2, 1024>}, {transform_indices = @transform_3, window_bounds = array<i64: 2, 1024>}]} {
    %c0 = arith.constant 0 : index
    %c0_0 = arith.constant 0 : index
    %0 = memref.load %arg1[%c0, %c0_0] : memref<1x1xf32, #tpu.memory_space<smem>>
    %c0_1 = arith.constant 0 : index
    %c0_2 = arith.constant 0 : index
    %1 = vector.load %arg2[%c0_1, %c0_2] : memref<2x1024xf32, #tpu.memory_space<vmem>>, vector<2x1024xf32>
    %c0_3 = arith.constant 0 : index
    %c0_4 = arith.constant 0 : index
    %2 = vector.load %arg3[%c0_3, %c0_4] : memref<2x1024xf32, #tpu.memory_space<vmem>>, vector<2x1024xf32>
    %3 = vector.broadcast %0 : f32 to vector<2x1024xf32>
    %4 = arith.mulf %2, %3 : vector<2x1024xf32>
    %5 = arith.addf %1, %4 : vector<2x1024xf32>
    %c0_5 = arith.constant 0 : index
    %c0_6 = arith.constant 0 : index
    %6 = vector.load %arg4[%c0_5, %c0_6] : memref<2x1024xf32, #tpu.memory_space<vmem>>, vector<2x1024xf32>
    tpu.vector_store %arg4[%c0_5, %c0_6], %5 {strides = array<i32>} : memref<2x1024xf32, #tpu.memory_space<vmem>>, vector<2x1024xf32>,
    return
  }
  func.func @transform_0(%arg0: i32) -> (i32, i32) {
    %c0_i32 = arith.constant 0 : i32
    %c0_i32_0 = arith.constant 0 : i32
    %c0_i32_1 = arith.constant 0 : i32
    return %c0_i32, %c0_i32_0 : i32, i32
  }
  func.func @transform_1(%arg0: i32) -> (i32, i32) {
    %c0_i32 = arith.constant 0 : i32
    %c0_i32_0 = arith.constant 0 : i32
    return %arg0, %c0_i32 : i32, i32
  }
  func.func @transform_2(%arg0: i32) -> (i32, i32) {
    %c0_i32 = arith.constant 0 : i32
    %c0_i32_0 = arith.constant 0 : i32
    return %arg0, %c0_i32 : i32, i32
  }
  func.func @transform_3(%arg0: i32) -> (i32, i32) {
    %c0_i32 = arith.constant 0 : i32
    %c0_i32_0 = arith.constant 0 : i32
    return %arg0, %c0_i32 : i32, i32
  }
}

</mosaic_0001>

<bundles_post_ra>
// kernel: tpu_custom_call.1
= control target key start
LH: loop header
LB: loop body
LE: loop exit
PB: predicated region body
PF: predicated region fallthrough
CT: control target
= control target key end

     0   :  { %9 = vsyncpa [#allocation4], 0  ;;  %s190_s0 = inlined_call_operand.<no memory space> [shape: f32[1,1], index: 0, kind: input, shape index: {}]   ;;  %s191_s1 = inlined_call_operand.hbm [shape: f32[2,1024], index: 1, kind: input, shape index: {}]   ;;  %s192_s2 = inlined_call_operand.hbm [shape: f32[2,1024], index: 2, kind: input, shape index: {}]   ;;  %s193_s3 = inlined_call_operand.hbm [shape: f32[2,1024], index: 3, kind: output, shape index: {}]  }
   0x1   :  { %10 = vsyncpa [#allocation7], 0 }
   0x2   :  { %11 = vsyncpa [#allocation5], 0  ;;  %s19_s14 = sshll.u32 %s191_s1, 4  ;;  %s155_s15 = smov [#allocation3]   ;;  %s20_s14 = int_to_ptr.hbm [resolvable:$true] %s19_s14 }
   0x3   :  { %s21_s16 = sshll.u32 %s155_s15, 4  ;;  %s30_s19 = sshll.u32 %s192_s2, 4  ;;  %s22_s16 = int_to_ptr.vmem [resolvable:$true] %s21_s16  ;;  %s31_s19 = int_to_ptr.hbm [resolvable:$true] %s30_s19 }
   0x4   :  { %24 = dma.hbm_to_vmem [thread:$0]  %s20_s14, 256, %s22_s16, [#allocation4]  }
   0x5   :  { %s156_s20 = smov [#allocation6]  }
   0x6   :  { %s32_s21 = sshll.u32 %s156_s20, 4  ;;  %s33_s21 = int_to_ptr.vmem [resolvable:$true] %s32_s21 }
   0x7   :  { %35 = dma.hbm_to_vmem [thread:$0]  %s31_s19, 256, %s33_s21, [#allocation7]  }
   0x8   :  { %149 = dma.done.wait [#allocation4], 256  }
   0x9   :  { %150 = vsyncadd [#allocation4], 4294967040 }
   0xa   :  { %151 = dma.done.wait [#allocation7], 256  }
   0xb   :  { %152 = vsyncadd [#allocation7], 4294967040  ;;  %v49_v0 = vstv %s190_s0  ;;  %v45_v1 = vld [vmem:[#allocation3] sm:$0xff]  ;;  %v47_v2 = vld [vmem:[#allocation6] sm:$0xff]  ;;  %s157_s2 = smov [#allocation8]   ;;  %s63_s26 = sshll.u32 %s193_s3, 4  ;;  %s64_s26 = int_to_ptr.hbm [resolvable:$true] %s63_s26 }
   0xc   :  { %v50_v3 = vmul.f32 %v49_v0, %v47_v2  ;;  %v46_v4 = vld [vmem:[#allocation3 + $0x8] sm:$0xff]  ;;  %v48_v5 = vld [vmem:[#allocation6 + $0x8] sm:$0xff]  ;;  %s61_s23 = sshll.u32 %s157_s2, 4  ;;  %s62_s23 = int_to_ptr.vmem [resolvable:$true] %s61_s23 }
   0xd   :  { %v51_v6 = vmul.f32 %v49_v0, %v48_v5 }
   0xe   :  { %v52_v7 = vadd.f32 %v50_v3, %v45_v1 }
   0xf   :  { %v53_v8 = vadd.f32 %v51_v6, %v46_v4 }
  0x10   :  { %54 = vst [vmem:[#allocation8] sm:$0xff] %v52_v7 }
  0x11   :  { %55 = vst [vmem:[#allocation8 + $0x8] sm:$0xff] %v53_v8 }
  0x12   :  { %66 = dma.vmem_to_hbm [thread:$0]  %s62_s23, 256, %s64_s26, [#allocation5]  }
  0x13   :  { %153 = dma.done.wait [#allocation5], 256  }
  0x14   :  { %154 = vsyncadd [#allocation5], 4294967040 }
  0x15   :  { %71 = vsyncpa [#allocation4], 1 }
  0x16   :  { %72 = vsyncpa [#allocation7], 1 }
  0x17   :  { %73 = vsyncpa [#allocation5], 1 }

</bundles_post_ra>
